<compile_context>
chip_gen: v6e
topology: v6e:2x2x1
jax: 0.10.0
libtpu: 0.0.40
codegen_flags: <defaults>
</compile_context>

<pallas_src>
import functools

import numpy as np
import jax
import jax.numpy as jnp
from jax.experimental import pallas as pl
from jax.experimental.pallas import tpu as pltpu

# --- module hyper-parameters (small, consistent with the STFT module) ---------
FILTER_LENGTH = 64                           # n_fft
HOP_LENGTH = 16
WIN_LENGTH = 64                              # == filter_length -> pad_center is a no-op
CUTOFF = FILTER_LENGTH // 2 + 1              # 33
R = FILTER_LENGTH // HOP_LENGTH              # overlapping frames per hop-chunk (4)
SCALE = float(FILTER_LENGTH) / float(HOP_LENGTH)
LANES = 128                                  # packed [re | im | zero-pad] coefficient width


# ------------------------------------------------------------------------------
# Deterministic parameter construction (mirrors STFT.__init__ with 'hann')
# ------------------------------------------------------------------------------
def _hann_periodic(win_length):
    n = np.arange(win_length)
    return 0.5 - 0.5 * np.cos(2.0 * np.pi * n / win_length)   # fftbins=True


def make_stft_params():
    fourier_basis = np.fft.fft(np.eye(FILTER_LENGTH))
    fb = np.vstack([np.real(fourier_basis[:CUTOFF, :]),
                    np.imag(fourier_basis[:CUTOFF, :])])          # (2C, F)
    inv_b = np.linalg.pinv(SCALE * fb).T                          # (2C, F)
    fft_window = _hann_periodic(WIN_LENGTH)                       # (F,)
    forward_basis = (fb * fft_window[None, :]).astype(np.float32)     # (2C, F)
    inverse_basis = (inv_b * fft_window[None, :]).astype(np.float32)  # (2C, F)
    return forward_basis, inverse_basis, fft_window.astype(np.float32)


def window_sumsquare_np(fft_window, n_frames):
    # window_sumsquare(window='hann', norm=None, win_length == n_fft)
    n = FILTER_LENGTH + HOP_LENGTH * (n_frames - 1)
    win_sq = fft_window.astype(np.float32) ** 2
    x = np.zeros(n, dtype=np.float32)
    for i in range(n_frames):
        s = i * HOP_LENGTH
        x[s:min(n, s + FILTER_LENGTH)] += win_sq[:max(0, min(FILTER_LENGTH, n - s))]
    return x


# ------------------------------------------------------------------------------
# Fused kernel: transform + (identity) recombination + inverse + OLA + window fix
# ------------------------------------------------------------------------------
def _stft_fused_kernel(audio_ref, fwd_ref, inv_ref, ola_ref, wdiv_ref,
                       mag_ref, out_ref, *, cutoff, hop, n_overlap, n_frames):
    a = audio_ref[0]          # (n_chunks, hop): hop-strided view of the padded audio
    w = fwd_ref[...]          # (F, 128) packed forward basis [re | im | 0]

    # Forward conv1d-as-matmul, K-decomposed over the R hop-chunks of each frame:
    #   frames[:, r*hop:(r+1)*hop] == a[r:r+T, :]
    # so frames @ W == sum_r a[r:r+T, :] @ W[r*hop:(r+1)*hop, :].  The (T, F)
    # frame matrix is never materialized.
    coef = jnp.dot(a[0:n_frames, :], w[0:hop, :],
                   preferred_element_type=jnp.float32)             # (T, 128)
    for r in range(1, n_overlap):
        coef = coef + jnp.dot(a[r:r + n_frames, :], w[r * hop:(r + 1) * hop, :],
                              preferred_element_type=jnp.float32)

    re = coef[:, :cutoff]                                          # (T, C)
    im = coef[:, cutoff:2 * cutoff]                                # (T, C)
    mag_ref[0] = jnp.sqrt(re * re + im * im)

    # Inverse transform.  mag*cos(phase) == re, mag*sin(phase) == im exactly, so
    # the packed forward coefficients feed the packed inverse basis directly
    # (no atan2/cos/sin anywhere).  Lanes [2C:128) of coef are exact zeros.
    contrib = jnp.dot(coef, inv_ref[...],
                      preferred_element_type=jnp.float32)          # (T, F)

    # Overlap-add (conv_transpose1d with stride=hop) as R tiny constant selection
    # matmuls accumulated in registers -> single store, no RMW on the output tile.
    acc = jnp.dot(ola_ref[0], contrib[:, :hop],
                  preferred_element_type=jnp.float32)              # (n_chunks, hop)
    for r in range(1, n_overlap):
        acc = acc + jnp.dot(ola_ref[r], contrib[:, r * hop:(r + 1) * hop],
                            preferred_element_type=jnp.float32)

    # window_sumsquare correction + filter/hop rescale (pre-inverted on host).
    # TODO(synk): hop=16-wide output store is masked; for long audio emit a
    # lane-dense flat slab instead (negligible at these sizes).
    out_ref[0] = acc * wdiv_ref[...]


def stft_fused(audio_chunks, fwd_fused, inv_fused, ola_mats, inv_wdiv):
    B, n_chunks, hop = audio_chunks.shape
    n_frames = n_chunks - R + 1
    F = FILTER_LENGTH
    kernel = functools.partial(_stft_fused_kernel, cutoff=CUTOFF, hop=HOP_LENGTH,
                               n_overlap=R, n_frames=n_frames)
    mag, chunks = pl.pallas_call(
        kernel,
        grid=(B,),
        in_specs=[
            pl.BlockSpec((1, n_chunks, hop), lambda b: (b, 0, 0)),
            pl.BlockSpec((F, LANES), lambda b: (0, 0)),
            pl.BlockSpec((LANES, F), lambda b: (0, 0)),
            pl.BlockSpec((R, n_chunks, n_frames), lambda b: (0, 0, 0)),
            pl.BlockSpec((n_chunks, HOP_LENGTH), lambda b: (0, 0)),
        ],
        out_specs=(pl.BlockSpec((1, n_frames, CUTOFF), lambda b: (b, 0, 0)),
                   pl.BlockSpec((1, n_chunks, HOP_LENGTH), lambda b: (b, 0, 0))),
        out_shape=(jax.ShapeDtypeStruct((B, n_frames, CUTOFF), jnp.float32),
                   jax.ShapeDtypeStruct((B, n_chunks, HOP_LENGTH), jnp.float32)),
        compiler_params=pltpu.CompilerParams(dimension_semantics=("parallel",)),
    )(audio_chunks, fwd_fused, inv_fused, ola_mats, inv_wdiv)
    return mag, chunks


# ------------------------------------------------------------------------------
# Full forward pass:  reconstruction = inverse(transform(audio))
# ------------------------------------------------------------------------------
def stft_forward(audio, forward_basis, inverse_basis, fft_window):
    B, S = audio.shape
    assert S % HOP_LENGTH == 0, "chunked framing assumes hop | num_samples"
    pad = FILTER_LENGTH // 2
    n_frames = S // HOP_LENGTH + 1
    n_chunks = n_frames + R - 1                 # == (S + FILTER_LENGTH) // HOP_LENGTH

    # reflect pad (glue) + zero-cost contiguous reshape into hop-sized chunks.
    # TODO(synk): single block per batch keeps the whole sequence in VMEM; for
    # minutes-long audio tile the frame axis with a second grid dimension.
    x = jnp.pad(audio, ((0, 0), (pad, pad)), mode="reflect")            # (B, S + F)
    audio_chunks = x.reshape(B, n_chunks, HOP_LENGTH)                   # (B, n_chunks, hop)

    # packed, 128-lane-padded bases (one MXU contraction per direction)
    fwd_fused = np.zeros((FILTER_LENGTH, LANES), np.float32)
    fwd_fused[:, :2 * CUTOFF] = forward_basis.T                         # (F, 2C) -> (F, 128)
    inv_fused = np.zeros((LANES, FILTER_LENGTH), np.float32)
    inv_fused[:2 * CUTOFF, :] = inverse_basis                           # (2C, F) -> (128, F)

    # constant overlap-add selection matrices: ola[r, t + r, t] = 1
    ola = np.zeros((R, n_chunks, n_frames), np.float32)
    for r in range(R):
        ola[r, r:r + n_frames, :] = np.eye(n_frames, dtype=np.float32)

    # pre-inverted window-sum-square correction fused with the filter/hop scale
    wsum = window_sumsquare_np(fft_window, n_frames)                    # (n_chunks * hop,)
    tiny = np.finfo(np.float32).tiny
    safe = np.where(wsum > tiny, wsum, np.float32(1.0))
    inv_wdiv = np.where(wsum > tiny, SCALE / safe, SCALE).astype(np.float32)
    inv_wdiv = inv_wdiv.reshape(n_chunks, HOP_LENGTH)

    mag, chunks = stft_fused(audio_chunks,
                             jnp.asarray(fwd_fused), jnp.asarray(inv_fused),
                             jnp.asarray(ola), jnp.asarray(inv_wdiv))

    reconstruction = chunks.reshape(B, 1, n_chunks * HOP_LENGTH)[:, :, pad:-pad]
    # TODO(synk): the torch module's self.phase buffer is not materialized; the
    # recombination uses the exact identity mag*cos(phase)=re, mag*sin(phase)=im.
    return reconstruction, mag


# ------------------------------------------------------------------------------
# Pure numpy reference (same math as the torch module) for a correctness check.
# ------------------------------------------------------------------------------
def stft_reference(audio_np, forward_basis, inverse_basis, fft_window):
    B, S = audio_np.shape
    pad = FILTER_LENGTH // 2
    x = np.pad(audio_np, ((0, 0), (pad, pad)), mode="reflect")
    n_frames = S // HOP_LENGTH + 1
    idx = (np.arange(n_frames)[:, None] * HOP_LENGTH
           + np.arange(FILTER_LENGTH)[None, :])
    frames = x[:, idx]                                                  # (B, T, F)
    coef = frames @ forward_basis.T                                     # (B, T, 2C)
    re, im = coef[..., :CUTOFF], coef[..., CUTOFF:]
    mag = np.sqrt(re ** 2 + im ** 2)
    contrib = coef @ inverse_basis                                      # (B, T, F)
    n_out = FILTER_LENGTH + HOP_LENGTH * (n_frames - 1)
    out = np.zeros((B, n_out), np.float32)
    for t in range(n_frames):
        out[:, t * HOP_LENGTH:t * HOP_LENGTH + FILTER_LENGTH] += contrib[:, t]
    wsum = window_sumsquare_np(fft_window, n_frames)
    nz = wsum > np.finfo(np.float32).tiny
    out[:, nz] /= wsum[nz]
    out *= SCALE
    return out[:, None, pad:-pad], mag


if __name__ == "__main__":
    assert FILTER_LENGTH % HOP_LENGTH == 0, "overlap-add kernel assumes hop | filter_length"
    key = jax.random.PRNGKey(0)
    B, S = 2, 256
    audio = jax.random.normal(key, (B, S), dtype=jnp.float32)

    forward_basis, inverse_basis, fft_window = make_stft_params()
    recon, mag = stft_forward(audio, forward_basis, inverse_basis, fft_window)
    recon, mag = jax.block_until_ready((recon, mag))

    assert recon.shape == (B, 1, S) and recon.dtype == jnp.float32
    assert mag.shape == (B, S // HOP_LENGTH + 1, CUTOFF)

    ref_recon, ref_mag = stft_reference(np.asarray(audio), forward_basis,
                                        inverse_basis, fft_window)
    np.testing.assert_allclose(np.asarray(recon), ref_recon, rtol=2e-3, atol=2e-3)
    np.testing.assert_allclose(np.asarray(mag), ref_mag, rtol=2e-3, atol=2e-3)

    print("KERNEL_OK")
</pallas_src>

<mosaic_0001>
module attributes {stable_mosaic.version = 11 : i64} {
  func.func @_stft_fused_kernel(%arg0: i32, %arg1: memref<1x20x16xf32, #tpu.memory_space<vmem>>, %arg2: memref<64x128xf32, #tpu.memory_space<vmem>>, %arg3: memref<128x64xf32, #tpu.memory_space<vmem>>, %arg4: memref<4x20x17xf32, #tpu.memory_space<vmem>>, %arg5: memref<20x16xf32, #tpu.memory_space<vmem>>, %arg6: memref<1x17x33xf32, #tpu.memory_space<vmem>>, %arg7: memref<1x20x16xf32, #tpu.memory_space<vmem>>) attributes {dimension_semantics = [#tpu.dimension_semantics<parallel>], iteration_bounds = array<i64: 2>, scalar_prefetch = 0 : i64, scratch_operands = 0 : i64, tpu.core_type = #tpu.core_type<tc>, window_params = [{transform_indices = @transform_0, window_bounds = array<i64: 1, 20, 16>}, {pipeline_mode = #tpu.pipeline_mode<synchronous>, transform_indices = @transform_1, window_bounds = array<i64: 64, 128>}, {pipeline_mode = #tpu.pipeline_mode<synchronous>, transform_indices = @transform_2, window_bounds = array<i64: 128, 64>}, {pipeline_mode = #tpu.pipeline_mode<synchronous>, transform_indices = @transform_3, window_bounds = array<i64: 4, 20, 17>}, {pipeline_mode = #tpu.pipeline_mode<synchronous>, transform_indices = @transform_4, window_bounds = array<i64: 20, 16>}, {transform_indices = @transform_5, window_bounds = array<i64: 1, 17, 33>}, {transform_indices = @transform_6, window_bounds = array<i64: 1, 20, 16>}]} {
    %c0 = arith.constant 0 : index
    %c0_0 = arith.constant 0 : index
    %c0_1 = arith.constant 0 : index
    %0 = vector.load %arg1[%c0, %c0_0, %c0_1] : memref<1x20x16xf32, #tpu.memory_space<vmem>>, vector<1x20x16xf32>
    %1 = vector.shape_cast %0 : vector<1x20x16xf32> to vector<20x16xf32>
    %c0_2 = arith.constant 0 : index
    %c0_3 = arith.constant 0 : index
    %2 = vector.load %arg2[%c0_2, %c0_3] : memref<64x128xf32, #tpu.memory_space<vmem>>, vector<64x128xf32>
    %3 = vector.extract_strided_slice %1 {offsets = [0, 0], sizes = [17, 16], strides = [1, 1]} : vector<20x16xf32> to vector<17x16xf32>
    %4 = vector.extract_strided_slice %2 {offsets = [0, 0], sizes = [16, 128], strides = [1, 1]} : vector<64x128xf32> to vector<16x128xf32>
    %cst = arith.constant dense<0.000000e+00> : vector<17x128xf32>
    %5 = tpu.matmul %3, %4, %cst {dimension_numbers = #tpu.dot_dimension_numbers<[1], [0], [0], [1], [0, 0, 1, 1], [], []>} : vector<17x16xf32>, vector<16x128xf32>, vector<17x128xf32> -> vector<17x128xf32>
    %6 = vector.extract_strided_slice %1 {offsets = [1, 0], sizes = [17, 16], strides = [1, 1]} : vector<20x16xf32> to vector<17x16xf32>
    %7 = vector.extract_strided_slice %2 {offsets = [16, 0], sizes = [16, 128], strides = [1, 1]} : vector<64x128xf32> to vector<16x128xf32>
    %cst_4 = arith.constant dense<0.000000e+00> : vector<17x128xf32>
    %8 = tpu.matmul %6, %7, %cst_4 {dimension_numbers = #tpu.dot_dimension_numbers<[1], [0], [0], [1], [0, 0, 1, 1], [], []>} : vector<17x16xf32>, vector<16x128xf32>, vector<17x128xf32> -> vector<17x128xf32>
    %9 = arith.addf %5, %8 : vector<17x128xf32>
    %10 = vector.extract_strided_slice %1 {offsets = [2, 0], sizes = [17, 16], strides = [1, 1]} : vector<20x16xf32> to vector<17x16xf32>
    %11 = vector.extract_strided_slice %2 {offsets = [32, 0], sizes = [16, 128], strides = [1, 1]} : vector<64x128xf32> to vector<16x128xf32>
    %cst_5 = arith.constant dense<0.000000e+00> : vector<17x128xf32>
    %12 = tpu.matmul %10, %11, %cst_5 {dimension_numbers = #tpu.dot_dimension_numbers<[1], [0], [0], [1], [0, 0, 1, 1], [], []>} : vector<17x16xf32>, vector<16x128xf32>, vector<17x128xf32> -> vector<17x128xf32>
    %13 = arith.addf %9, %12 : vector<17x128xf32>
    %14 = vector.extract_strided_slice %1 {offsets = [3, 0], sizes = [17, 16], strides = [1, 1]} : vector<20x16xf32> to vector<17x16xf32>
    %15 = vector.extract_strided_slice %2 {offsets = [48, 0], sizes = [16, 128], strides = [1, 1]} : vector<64x128xf32> to vector<16x128xf32>
    %cst_6 = arith.constant dense<0.000000e+00> : vector<17x128xf32>
    %16 = tpu.matmul %14, %15, %cst_6 {dimension_numbers = #tpu.dot_dimension_numbers<[1], [0], [0], [1], [0, 0, 1, 1], [], []>} : vector<17x16xf32>, vector<16x128xf32>, vector<17x128xf32> -> vector<17x128xf32>
    %17 = arith.addf %13, %16 : vector<17x128xf32>
    %18 = vector.extract_strided_slice %17 {offsets = [0, 0], sizes = [17, 33], strides = [1, 1]} : vector<17x128xf32> to vector<17x33xf32>
    %19 = vector.extract_strided_slice %17 {offsets = [0, 33], sizes = [17, 33], strides = [1, 1]} : vector<17x128xf32> to vector<17x33xf32>
    %20 = arith.mulf %18, %18 : vector<17x33xf32>
    %21 = arith.mulf %19, %19 : vector<17x33xf32>
    %22 = arith.addf %20, %21 : vector<17x33xf32>
    %23 = math.sqrt %22 : vector<17x33xf32>
    %c0_7 = arith.constant 0 : index
    %c0_8 = arith.constant 0 : index
    %c0_9 = arith.constant 0 : index
    %24 = vector.load %arg6[%c0_7, %c0_8, %c0_9] : memref<1x17x33xf32, #tpu.memory_space<vmem>>, vector<1x17x33xf32>
    %25 = vector.shape_cast %24 : vector<1x17x33xf32> to vector<17x33xf32>
    %26 = vector.shape_cast %23 : vector<17x33xf32> to vector<1x17x33xf32>
    tpu.vector_store %arg6[%c0_7, %c0_8, %c0_9], %26 {strides = array<i32>} : memref<1x17x33xf32, #tpu.memory_space<vmem>>, vector<1x17x33xf32>,
    %c0_10 = arith.constant 0 : index
    %c0_11 = arith.constant 0 : index
    %27 = vector.load %arg3[%c0_10, %c0_11] : memref<128x64xf32, #tpu.memory_space<vmem>>, vector<128x64xf32>
    %cst_12 = arith.constant dense<0.000000e+00> : vector<17x64xf32>
    %28 = tpu.matmul %17, %27, %cst_12 {dimension_numbers = #tpu.dot_dimension_numbers<[1], [0], [0], [1], [0, 0, 1, 1], [], []>} : vector<17x128xf32>, vector<128x64xf32>, vector<17x64xf32> -> vector<17x64xf32>
    %c0_13 = arith.constant 0 : index
    %c0_14 = arith.constant 0 : index
    %c0_15 = arith.constant 0 : index
    %29 = vector.load %arg4[%c0_13, %c0_14, %c0_15] : memref<4x20x17xf32, #tpu.memory_space<vmem>>, vector<1x20x17xf32>
    %30 = vector.shape_cast %29 : vector<1x20x17xf32> to vector<20x17xf32>
    %31 = vector.extract_strided_slice %28 {offsets = [0, 0], sizes = [17, 16], strides = [1, 1]} : vector<17x64xf32> to vector<17x16xf32>
    %cst_16 = arith.constant dense<0.000000e+00> : vector<20x16xf32>
    %32 = tpu.matmul %30, %31, %cst_16 {dimension_numbers = #tpu.dot_dimension_numbers<[1], [0], [0], [1], [0, 0, 1, 1], [], []>} : vector<20x17xf32>, vector<17x16xf32>, vector<20x16xf32> -> vector<20x16xf32>
    %c1 = arith.constant 1 : index
    %c0_17 = arith.constant 0 : index
    %c0_18 = arith.constant 0 : index
    %33 = vector.load %arg4[%c1, %c0_17, %c0_18] : memref<4x20x17xf32, #tpu.memory_space<vmem>>, vector<1x20x17xf32>
    %34 = vector.shape_cast %33 : vector<1x20x17xf32> to vector<20x17xf32>
    %35 = vector.extract_strided_slice %28 {offsets = [0, 16], sizes = [17, 16], strides = [1, 1]} : vector<17x64xf32> to vector<17x16xf32>
    %cst_19 = arith.constant dense<0.000000e+00> : vector<20x16xf32>
    %36 = tpu.matmul %34, %35, %cst_19 {dimension_numbers = #tpu.dot_dimension_numbers<[1], [0], [0], [1], [0, 0, 1, 1], [], []>} : vector<20x17xf32>, vector<17x16xf32>, vector<20x16xf32> -> vector<20x16xf32>
    %37 = arith.addf %32, %36 : vector<20x16xf32>
    %c2 = arith.constant 2 : index
    %c0_20 = arith.constant 0 : index
    %c0_21 = arith.constant 0 : index
    %38 = vector.load %arg4[%c2, %c0_20, %c0_21] : memref<4x20x17xf32, #tpu.memory_space<vmem>>, vector<1x20x17xf32>
    %39 = vector.shape_cast %38 : vector<1x20x17xf32> to vector<20x17xf32>
    %40 = vector.extract_strided_slice %28 {offsets = [0, 32], sizes = [17, 16], strides = [1, 1]} : vector<17x64xf32> to vector<17x16xf32>
    %cst_22 = arith.constant dense<0.000000e+00> : vector<20x16xf32>
    %41 = tpu.matmul %39, %40, %cst_22 {dimension_numbers = #tpu.dot_dimension_numbers<[1], [0], [0], [1], [0, 0, 1, 1], [], []>} : vector<20x17xf32>, vector<17x16xf32>, vector<20x16xf32> -> vector<20x16xf32>
    %42 = arith.addf %37, %41 : vector<20x16xf32>
    %c3 = arith.constant 3 : index
    %c0_23 = arith.constant 0 : index
    %c0_24 = arith.constant 0 : index
    %43 = vector.load %arg4[%c3, %c0_23, %c0_24] : memref<4x20x17xf32, #tpu.memory_space<vmem>>, vector<1x20x17xf32>
    %44 = vector.shape_cast %43 : vector<1x20x17xf32> to vector<20x17xf32>
    %45 = vector.extract_strided_slice %28 {offsets = [0, 48], sizes = [17, 16], strides = [1, 1]} : vector<17x64xf32> to vector<17x16xf32>
    %cst_25 = arith.constant dense<0.000000e+00> : vector<20x16xf32>
    %46 = tpu.matmul %44, %45, %cst_25 {dimension_numbers = #tpu.dot_dimension_numbers<[1], [0], [0], [1], [0, 0, 1, 1], [], []>} : vector<20x17xf32>, vector<17x16xf32>, vector<20x16xf32> -> vector<20x16xf32>
    %47 = arith.addf %42, %46 : vector<20x16xf32>
    %c0_26 = arith.constant 0 : index
    %c0_27 = arith.constant 0 : index
    %48 = vector.load %arg5[%c0_26, %c0_27] : memref<20x16xf32, #tpu.memory_space<vmem>>, vector<20x16xf32>
    %49 = arith.mulf %47, %48 : vector<20x16xf32>
    %c0_28 = arith.constant 0 : index
    %c0_29 = arith.constant 0 : index
    %c0_30 = arith.constant 0 : index
    %50 = vector.load %arg7[%c0_28, %c0_29, %c0_30] : memref<1x20x16xf32, #tpu.memory_space<vmem>>, vector<1x20x16xf32>
    %51 = vector.shape_cast %50 : vector<1x20x16xf32> to vector<20x16xf32>
    %52 = vector.shape_cast %49 : vector<20x16xf32> to vector<1x20x16xf32>
    tpu.vector_store %arg7[%c0_28, %c0_29, %c0_30], %52 {strides = array<i32>} : memref<1x20x16xf32, #tpu.memory_space<vmem>>, vector<1x20x16xf32>,
    return
  }
  func.func @transform_0(%arg0: i32) -> (i32, i32, i32) {
    %c0_i32 = arith.constant 0 : i32
    %c0_i32_0 = arith.constant 0 : i32
    %c0_i32_1 = arith.constant 0 : i32
    return %arg0, %c0_i32, %c0_i32_0 : i32, i32, i32
  }
  func.func @transform_1(%arg0: i32) -> (i32, i32) {
    %c0_i32 = arith.constant 0 : i32
    %c0_i32_0 = arith.constant 0 : i32
    %c0_i32_1 = arith.constant 0 : i32
    return %c0_i32, %c0_i32_0 : i32, i32
  }
  func.func @transform_2(%arg0: i32) -> (i32, i32) {
    %c0_i32 = arith.constant 0 : i32
    %c0_i32_0 = arith.constant 0 : i32
    %c0_i32_1 = arith.constant 0 : i32
    return %c0_i32, %c0_i32_0 : i32, i32
  }
  func.func @transform_3(%arg0: i32) -> (i32, i32, i32) {
    %c0_i32 = arith.constant 0 : i32
    %c0_i32_0 = arith.constant 0 : i32
    %c0_i32_1 = arith.constant 0 : i32
    %c0_i32_2 = arith.constant 0 : i32
    return %c0_i32, %c0_i32_0, %c0_i32_1 : i32, i32, i32
  }
  func.func @transform_4(%arg0: i32) -> (i32, i32) {
    %c0_i32 = arith.constant 0 : i32
    %c0_i32_0 = arith.constant 0 : i32
    %c0_i32_1 = arith.constant 0 : i32
    return %c0_i32, %c0_i32_0 : i32, i32
  }
  func.func @transform_5(%arg0: i32) -> (i32, i32, i32) {
    %c0_i32 = arith.constant 0 : i32
    %c0_i32_0 = arith.constant 0 : i32
    %c0_i32_1 = arith.constant 0 : i32
    return %arg0, %c0_i32, %c0_i32_0 : i32, i32, i32
  }
  func.func @transform_6(%arg0: i32) -> (i32, i32, i32) {
    %c0_i32 = arith.constant 0 : i32
    %c0_i32_0 = arith.constant 0 : i32
    %c0_i32_1 = arith.constant 0 : i32
    return %arg0, %c0_i32, %c0_i32_0 : i32, i32, i32
  }
}

</mosaic_0001>

<bundles_post_ra>
// kernel: tpu_custom_call.1
= control target key start
LH: loop header
LB: loop body
LE: loop exit
PB: predicated region body
PF: predicated region fallthrough
CT: control target
= control target key end

     0   :  { %s1637_s21 = smov 0   ;;  %s1924_s0 = inlined_call_operand.vmem [shape: f32[2,20,16], index: 0, kind: input, shape index: {}]   ;;  %s1925_s1 = inlined_call_operand.vmem [shape: f32[64,128], index: 1, kind: input, shape index: {}]   ;;  %s1926_s2 = inlined_call_operand.vmem [shape: f32[128,64], index: 2, kind: input, shape index: {}]   ;;  %s1927_s3 = inlined_call_operand.vmem [shape: f32[4,20,17], index: 3, kind: input, shape index: {}]   ;;  %s1928_s4 = inlined_call_operand.vmem [shape: f32[20,16], index: 4, kind: input, shape index: {}]   ;;  %s1929_s5 = inlined_call_operand.vmem [shape: f32[2,17,33], index: 5, kind: output, shape index: {0}]   ;;  %s1930_s6 = inlined_call_operand.vmem [shape: f32[2,20,16], index: 6, kind: output, shape index: {1}]  }
   0x1 LB: > { %s1300_s22 = sadd.s32 4294967295, %s1594_s21   ;;  %p1304_p0 = scmp.ge.s32.totalorder %s1594_s21, 1  ;;  %s1594_s21 = sphi %s1637_s21, %s17_s21  }
   0x2   : > { %p215_p1 = scmp.lt.s32.totalorder %s1594_s21, 3 }
   0x4   : > { %p216_p2 = pnand %p1304_p0, %p215_p1 }
   0x5   : > { %p250_p3 = scmp.lt.s32.totalorder (!%p216_p2), %s1300_s22, 1  ;;  %s1598_s7 = smov (!%p216_p2), 112  }
   0x6   : > { %219 = sbr.rel (%p216_p2) target bundleno = 784 (0x310), region = 40  ;;  %s1599_s8 = smov (!%p216_p2), 96  }
   0x7   : > { %s1600_s9 = smov (!%p216_p2), 80   ;;  %s1601_s10 = smov (!%p216_p2), 95  }
   0xb   : > { %v271_v0 = vld [vmem:[%s1925_s1 + $0x18] sm:$0xff]  ;;  %v1596_v1 = vmov 0.0   ;;  %v270_v2 = vld [vmem:[%s1925_s1 + $0x10] sm:$0xff]  ;;  %s1932_s22 = smov (!%p250_p3, %s1300_s22), 1  ;;  %vm1597_vm0 = vmmov 0   ;;  %vm285_vm1 = vcmask 130048  }
   0xc   : > { %1563 = vmatprep.subr.mxu1 %v1596_v1  ;;  %1410 = vmatprep.subr.mxu0 %v1596_v1  ;;  %s1657_s27 = smul.u32 24, %s1932_s22  ;;  %vm279_vm2 = vcmask 1046528   ;;  %v269_v9 = vld [vmem:[%s1925_s1 + $0x8] sm:$0xff]  ;;  %v268_v11 = vld [vmem:[%s1925_s1] sm:$0xff]  ;;  %vm458_vm3 = vcmask 1045504   ;;  %v275_v18 = vld [vmem:[%s1925_s1 + $0x38] sm:$0xff] }
   0xd   : > { %1565 = vmatpush3.msra.mxu1 %v271_v0  ;;  %1411 = vmatpush3.msra.mxu0 %v271_v0  ;;  %v273_v12 = vld [vmem:[%s1925_s1 + $0x28] sm:$0xff]  ;;  %v272_v16 = vld [vmem:[%s1925_s1 + $0x20] sm:$0xff]  ;;  %v707_v20 = vld [vmem:[%s1926_s2 + $0x78] sm:$0xff]  ;;  %vm553_vm4 = vcmask 1044480   ;;  %vm816_vm5 = vcmask 1040384   ;;  %vm806_vm6 = vcmask 138240  }
   0xe   : > { %1564 = vmatprep.subr.mxu1 %v1596_v1  ;;  %1412 = vmatprep.subr.mxu0 %v1596_v1  ;;  %s254_s30 = scalar_lea.vmem %s1924_s0, %s1657_s27  ;;  %v274_v24 = vld [vmem:[%s1925_s1 + $0x30] sm:$0xff]  ;;  %v705_v28 = vld [vmem:[%s1926_s2 + $0x68] sm:$0xff]  ;;  %v704_v30 = vld [vmem:[%s1926_s2 + $0x60] sm:$0xff]  ;;  %s1886_s11 = scalar_lea.vmem %s1929_s5, %s1657_s27  ;;  %vm687_vm7 = vcmask 269312   ;;  %vm690_vm10 = vcmask 262144   ;;  %vm1210_vm15 = vcmask 125952  }
   0xf   : > { %1566 = vmatpush3.msra.mxu1 %v270_v2  ;;  %1420 = vmatprep.mubr.msk.f32.mxu1 %vm1597_vm0, %v1596_v1  ;;  %v1667_v3 = vld [vmem:[%s254_s30 + $0x10] sm:$0xf]  ;;  %v265_v4 = vld [vmem:[%s254_s30] sm:$0xff]  ;;  %v1669_v5 = vld [vmem:[%s254_s30 + $0x8] sm:$0xff]  ;;  %s264_s20 = scalar_lea.vmem %s1930_s6, %s1657_s27 }
  0x10   : > { %1413 = vmatpush3.msra.mxu0 %v270_v2  ;;  %1414 = vmatprep.mubr.msk.f32.mxu0 %vm1597_vm0, %v1596_v1  ;;  %v283_v6 = vrot.slane %v1667_v3, 1  ;;  %v280_v7 = vrot.slane %v265_v4, 1  ;;  %v281_v8 = vrot.slane %v1669_v5, 1  ;;  %v459_v14 = vrot.slane %v265_v4, 2  ;;  %v706_v25 = vld [vmem:[%s1926_s2 + $0x70] sm:$0xff]  ;;  %v703_v31 = vld [vmem:[%s1926_s2 + $0x58] sm:$0xff] }
  0x11   : > { %1423 = vmatprep.subr.mxu1 %v1596_v1  ;;  %1436 = vmatprep.subr.mxu0 %v1596_v1  ;;  %v460_v15 = vrot.slane %v1669_v5, 2  ;;  %v462_v19 = vrot.slane %v1667_v3, 2  ;;  %v554_v21 = vrot.slane %v265_v4, 3  ;;  %v555_v22 = vrot.slane %v1669_v5, 3  ;;  %v702_v32 = vld [vmem:[%s1926_s2 + $0x50] sm:$0xff]  ;;  %v701_v33 = vld [vmem:[%s1926_s2 + $0x48] sm:$0xff] }
  0x12   : > { %1421 = vmatmul.mubr.msk.f32.vlgmr.msra.gmra.mxu1 %vm285_vm1, %v283_v6  ;;  %v282_v10 = vsel %vm279_vm2, %v280_v7, %v281_v8  ;;  %v284_v13 = vsel %vm279_vm2, %v281_v8, %v283_v6  ;;  %v557_v27 = vrot.slane %v1667_v3, 3  ;;  %v700_v34 = vld [vmem:[%s1926_s2 + $0x40] sm:$0xff]  ;;  %v699_v35 = vld [vmem:[%s1926_s2 + $0x38] sm:$0xff]  ;;  %v698_v36 = vld [vmem:[%s1926_s2 + $0x30] sm:$0xff] }
  0x13   : > { %1415 = vmatmul.mubr.msk.f32.vlgmr.msra.gmra.mxu0 %vm285_vm1, %v282_v10  ;;  %1424 = vmatpush3.msra.mxu1 %v269_v9  ;;  %v461_v17 = vsel %vm458_vm3, %v459_v14, %v460_v15  ;;  %v463_v23 = vsel %vm458_vm3, %v460_v15, %v462_v19  ;;  %v556_v26 = vsel %vm553_vm4, %v554_v21, %v555_v22  ;;  %v697_v37 = vld [vmem:[%s1926_s2 + $0x28] sm:$0xff]  ;;  %v696_v38 = vld [vmem:[%s1926_s2 + $0x20] sm:$0xff]  ;;  %v695_v39 = vld [vmem:[%s1926_s2 + $0x18] sm:$0xff] }
  0x14   : > { %1425 = vmatprep.subr.mxu1 %v1596_v1  ;;  %1427 = vmatprep.mubr.msk.f32.mxu1 %vm1597_vm0, %v1596_v1  ;;  %v558_v29 = vsel %vm553_vm4, %v555_v22, %v557_v27  ;;  %v694_v40 = vld [vmem:[%s1926_s2 + $0x10] sm:$0xff]  ;;  %v693_v41 = vld [vmem:[%s1926_s2 + $0x8] sm:$0xff]  ;;  %v692_v42 = vld [vmem:[%s1926_s2] sm:$0xff] }
  0x15   : > { %1426 = vmatpush3.msra.mxu1 %v268_v11  ;;  %1417 = vmatprep.mubr.msk.f32.mxu0 %vm1597_vm0, %v1596_v1 }
  0x16   : > { %1428 = vmatmul.mubr.msk.f32.vlgmr.msra.gmra.mxu1 %vm285_vm1, %v265_v4  ;;  %1437 = vmatpush3.msra.mxu0 %v273_v12 }
  0x17   : > { %1418 = vmatmul.mubr.msk.f32.gmra.mxu0 %vm285_vm1, %v284_v13  ;;  %1430 = vmatprep.mubr.msk.f32.mxu1 %vm1597_vm0, %v1596_v1 }
  0x18   : > { %1438 = vmatprep.subr.mxu0 %v1596_v1  ;;  %1440 = vmatprep.mubr.msk.f32.mxu0 %vm1597_vm0, %v1596_v1 }
  0x19   : > { %1439 = vmatpush3.msra.mxu0 %v272_v16  ;;  %1449 = vmatprep.subr.mxu1 %v1596_v1 }
  0x1a   : > { %1431 = vmatmul.mubr.msk.f32.gmra.mxu1 %vm285_vm1, %v1669_v5  ;;  %1462 = vmatprep.subr.mxu0 %v1596_v1 }
  0x1b   : > { %1441 = vmatmul.mubr.msk.f32.vlgmr.msra.gmra.mxu0 %vm285_vm1, %v461_v17  ;;  %1450 = vmatpush3.msra.mxu1 %v275_v18 }
  0x1c   : > { %1433 = vmatprep.mubr.msk.f32.mxu1 %vm1597_vm0, %v1596_v1  ;;  %1443 = vmatprep.mubr.msk.f32.mxu0 %vm1597_vm0, %v1596_v1 }
  0x1d   : > { %1451 = vmatprep.subr.mxu1 %v1596_v1  ;;  %1463 = vmatpush3.msra.mxu0 %v707_v20 }
  0x1e   : > { %1434 = vmatmul.mubr.msk.f32.gmra.mxu1 %vm285_vm1, %v1667_v3  ;;  %1464 = vmatprep.subr.mxu0 %v1596_v1 }
  0x1f   : > { %1444 = vmatmul.mubr.msk.f32.gmra.mxu0 %vm285_vm1, %v463_v23  ;;  %1452 = vmatpush3.msra.mxu1 %v274_v24 }
  0x20   : > { %1453 = vmatprep.mubr.msk.f32.mxu1 %vm1597_vm0, %v1596_v1  ;;  %1446 = vmatprep.mubr.msk.f32.mxu0 %vm1597_vm0, %v1596_v1 }
  0x21   : > { %1465 = vmatpush3.msra.mxu0 %v706_v25  ;;  %1503 = vmatprep.subr.mxu1 %v1596_v1 }
  0x22   : > { %1454 = vmatmul.mubr.msk.f32.vlgmr.msra.gmra.mxu1 %vm285_vm1, %v556_v26  ;;  %1466 = vmatprep.subr.mxu0 %v1596_v1 }
  0x23   : > { %1447 = vmatmul.mubr.msk.f32.gmra.mxu0 %vm285_vm1, %v462_v19  ;;  %1456 = vmatprep.mubr.msk.f32.mxu1 %vm1597_vm0, %v1596_v1 }
  0x24   : > { %1467 = vmatpush3.msra.mxu0 %v705_v28  ;;  %1494 = vmatprep.mubr.msk.f32.mxu0 %vm1597_vm0, %v1596_v1 }
  0x25   : > { %1468 = vmatprep.subr.mxu0 %v1596_v1 }
  0x26   : > { %1457 = vmatmul.mubr.msk.f32.gmra.mxu1 %vm285_vm1, %v558_v29  ;;  %1469 = vmatpush3.msra.mxu0 %v704_v30  ;;  %v1321_v30 = vld [vmem:[%s1927_s3 + $0x20] sm:$0xff] }
  0x27   : > { %1459 = vmatprep.mubr.msk.f32.mxu1 %vm1597_vm0, %v1596_v1  ;;  %1470 = vmatprep.subr.mxu0 %v1596_v1 }
  0x28   : > { %1471 = vmatpush3.msra.mxu0 %v703_v31 }
  0x29   : > { %1472 = vmatprep.subr.mxu0 %v1596_v1 }
  0x2a   : > { %1460 = vmatmul.mubr.msk.f32.gmra.mxu1 %vm285_vm1, %v557_v27  ;;  %1473 = vmatpush3.msra.mxu0 %v702_v32  ;;  %v1320_v27 = vld [vmem:[%s1927_s3 + $0x18] sm:$0xff] }
  0x2b   : > { %1474 = vmatprep.subr.mxu0 %v1596_v1  ;;  %1509 = vmatprep.mubr.msk.f32.mxu1 %vm1597_vm0, %v1596_v1 }
  0x2c   : > { %1475 = vmatpush3.msra.mxu0 %v701_v33 }
  0x2d   : > { %1476 = vmatprep.subr.mxu0 %v1596_v1 }
  0x2e   : > { %1477 = vmatpush3.msra.mxu0 %v700_v34  ;;  %v1322_v34 = vld [vmem:[%s1927_s3 + $0x28] sm:$0xf] }
  0x2f   : > { %1478 = vmatprep.subr.mxu0 %v1596_v1 }
  0x30   : > { %1479 = vmatpush3.msra.mxu0 %v699_v35  ;;  %v1338_v35 = vld [vmem:[%s1927_s3 + $0x48] sm:$0xff] }
  0x31   : > { %1480 = vmatprep.subr.mxu0 %v1596_v1 }
  0x32   : > { %1481 = vmatpush3.msra.mxu0 %v698_v36 }
  0x33   : > { %1482 = vmatprep.subr.mxu0 %v1596_v1 }
  0x34   : > { %1483 = vmatpush3.msra.mxu0 %v697_v37 }
  0x35   : > { %1484 = vmatprep.subr.mxu0 %v1596_v1 }
  0x36   : > { %1485 = vmatpush3.msra.mxu0 %v696_v38 }
  0x37   : > { %1486 = vmatprep.subr.mxu0 %v1596_v1 }
  0x38   : > { %1487 = vmatpush3.msra.mxu0 %v695_v39  ;;  %v788_v39 = vld [vmem:[%s1927_s3] sm:$0xff] }
  0x39   : > { %1488 = vmatprep.subr.mxu0 %v1596_v1 }
  0x3a   : > { %1489 = vmatpush3.msra.mxu0 %v694_v40  ;;  %v1339_v40 = vld [vmem:[%s1927_s3 + $0x50] sm:$0xff] }
  0x3b   : > { %1490 = vmatprep.subr.mxu0 %v1596_v1 }
  0x3c   : > { %1491 = vmatpush3.msra.mxu0 %v693_v41 }
  0x3d   : > { %1492 = vmatprep.subr.mxu0 %v1596_v1 }
  0x3e   : > { %1493 = vmatpush3.msra.mxu0 %v692_v42 }
  0x3f   : > { %1548 = vmatprep.subr.mxu0 %v1596_v1 }
  0xd2   : > { %v368_v43 = vpop.f32.mrf.mxu1 }
  0xd3   : > { %v358_v44 = vpop.f32.mrf.mxu0 }
  0xd4   : > { %v1422_v45 = vpop.f32.mrf.mxu1 }
  0xd5   : > { %v1416_v46 = vpop.f32.mrf.mxu0  ;;  %v790_v45 = vld [vmem:[%s1927_s3 + $0x10] sm:$0xf] }
  0xd6   : > { %v444_v47 = vpop.f32.mrf.mxu1 }
  0xd7   : > { %v363_v48 = vpop.f32.mrf.mxu0  ;;  %v445_v56 = vadd.f32 %v444_v47, %v358_v44  ;;  %v1340_v44 = vld [vmem:[%s1927_s3 + $0x58] sm:$0xf] }
  0xd8   : > { %v1429_v49 = vpop.f32.mrf.mxu1 }
  0xd9   : > { %v1419_v50 = vpop.f32.mrf.mxu0 }
  0xda   : > { %v449_v51 = vpop.f32.mrf.mxu1 }
  0xdb   : > { %v536_v52 = vpop.f32.mrf.mxu0  ;;  %v450_v62 = vadd.f32 %v449_v51, %v363_v48  ;;  %v1331_v48 = vld [vmem:[%s1927_s3 + $0x30] sm:$0xff] }
  0xdc   : > { %v1432_v53 = vpop.f32.mrf.mxu1  ;;  %v550_v59 = vadd.f32 %v536_v52, %v445_v56 }
  0xdd   : > { %v1442_v54 = vpop.f32.mrf.mxu0 }
  0xde   : > { %v454_v55 = vpop.f32.mrf.mxu1  ;;  %v1332_v54 = vld [vmem:[%s1927_s3 + $0x38] sm:$0xff] }
  0xdf   : > { %v541_v57 = vpop.f32.mrf.mxu0  ;;  %v455_v6 = vadd.f32 %v454_v55, %v368_v43  ;;  %v789_v43 = vld [vmem:[%s1927_s3 + $0x8] sm:$0xff] }
  0xe0   : > { %v1435_v58 = vpop.f32.mrf.mxu1  ;;  %v551_v3 = vadd.f32 %v541_v57, %v450_v62 }
  0xe1   : > { %v1445_v60 = vpop.f32.mrf.mxu0 }
  0xe2   : > { %v631_v61 = vpop.f32.mrf.mxu1  ;;  %v1333_v60 = vld [vmem:[%s1927_s3 + $0x40] sm:$0xf] }
  0xe3   : > { %v645_v63 = vadd.f32 %v631_v61, %v550_v59  ;;  %v546_v0 = vpop.f32.mrf.mxu0 }
  0xe4   : > { %v1455_v2 = vpop.f32.mrf.mxu1  ;;  %v552_v9 = vadd.f32 %v546_v0, %v455_v6 }
  0xe5   : > { %1495 = vmatmul.mubr.f32.vlgmr.msra.gmra.mxu0 %v645_v63  ;;  %v1448_v4 = vpop.f32.mrf.mxu0  ;;  %v648_v19 = vmul.f32 %v645_v63, %v645_v63 }
  0xe6   : > { %v636_v5 = vpop.f32.mrf.mxu1  ;;  %1497 = vmatprep.mubr.msk.f32.mxu0 %vm1597_vm0, %v1596_v1 }
  0xe7   : > { %v646_v7 = vadd.f32 %v636_v5, %v551_v3 }
  0xe8   : > { %v1458_v8 = vpop.f32.mrf.mxu1 }
  0xe9   : > { %1498 = vmatmul.mubr.f32.gmra.mxu0 %v646_v7  ;;  %v649_v21 = vmul.f32 %v646_v7, %v646_v7 }
  0xea   : > { %v641_v10 = vpop.f32.mrf.mxu1  ;;  %1500 = vmatprep.mubr.msk.f32.mxu0 %vm1597_vm0, %v1596_v1 }
  0xeb   : > { %v647_v11 = vadd.f32 %v641_v10, %v552_v9 }
  0xec   : > { %v1461_v12 = vpop.f32.mrf.mxu1 }
  0xed   : > { %1501 = vmatmul.mubr.f32.gmra.mxu0 %v647_v11  ;;  %v650_v20 = vmul.f32 %v647_v11, %v647_v11 }
  0xee   : > { %1554 = vmatprep.mubr.msk.f32.mxu0 %vm1597_vm0, %v1596_v1 }
 0x1a5   : > { %v774_v13 = vpop.f32.mrf.mxu0 }
 0x1a6   : > { %798 = vrot.lane.b32.xlu1 %v774_v13, %s1598_s7 }
 0x1a7   : > { %v1496_v14 = vpop.f32.mrf.mxu0 }
 0x1a9   : > { %v779_v15 = vpop.f32.mrf.mxu0 }
 0x1ab   : > { %v1499_v16 = vpop.f32.mrf.mxu0 }
 0x1ad   : > { %v784_v17 = vpop.f32.mrf.mxu0 }
 0x1ae   : > { %998 = vrot.lane.b32.xlu1 %v784_v17, %s1599_s8  ;;  %802 = vrot.lane.b32.xlu0 %v784_v17, %s1598_s7 }
 0x1af   : > { %v1502_v18 = vpop.f32.mrf.mxu0 }
 0x1b2   : > { %1104 = vrot.lane.b32.xlu1 %v784_v17, %s1600_s9  ;;  %800 = vrot.lane.b32.xlu0 %v779_v15, %s1598_s7 }
 0x1b6   : > { %1102 = vrot.lane.b32.xlu1 %v779_v15, %s1600_s9  ;;  %996 = vrot.lane.b32.xlu0 %v779_v15, %s1599_s8 }
 0x1ba   : > { %654 = vrot.lane.b32.xlu1 %v648_v19, %s1601_s10  ;;  %994 = vrot.lane.b32.xlu0 %v774_v13, %s1599_s8 }
 0x1be   : > { %658 = vrot.lane.b32.xlu1 %v650_v20, %s1601_s10  ;;  %1100 = vrot.lane.b32.xlu0 %v774_v13, %s1600_s9 }
 0x1c2   : > { %656 = vrot.lane.b32.xlu0 %v649_v21, %s1601_s10 }
 0x218   : > { %v799_v22 = vpop.permute.xlu1 %798 }
 0x220   : > { %v999_v23 = vpop.permute.xlu1 %998  ;;  %v803_v24 = vpop.permute.xlu0 %802 }
 0x221   : > { %1504 = vmatpush3.msk.msra.mxu1 %vm816_vm5, %v803_v24 }
 0x222   : > { %1505 = vmatprep.subr.mxu1 %v1596_v1 }
 0x224   : > { %v1105_v25 = vpop.permute.xlu1 %1104  ;;  %v801_v26 = vpop.permute.xlu0 %800 }
 0x225   : > { %1506 = vmatpush3.msra.mxu1 %v801_v26  ;;  %1549 = vmatpush3.msk.msra.mxu0 %vm816_vm5, %v1105_v25 }
 0x226   : > { %1507 = vmatprep.subr.mxu1 %v1596_v1  ;;  %1550 = vmatprep.subr.mxu0 %v1596_v1 }
 0x227   : > { %1508 = vmatpush3.msra.mxu1 %v799_v22  ;;  %v1202_v22 = vld [vmem:[%s1928_s4] sm:$0xff] }
 0x228   : > { %v1103_v28 = vpop.permute.xlu1 %1102  ;;  %1510 = vmatmul.mubr.msk.f32.vlgmr.msra.gmra.mxu1 %vm806_vm6, %v1320_v27  ;;  %1518 = vmatprep.subr.mxu1 %v1596_v1  ;;  %v997_v29 = vpop.permute.xlu0 %996 }
 0x229   : > { %1519 = vmatpush3.msk.msra.mxu1 %vm816_vm5, %v784_v17  ;;  %1551 = vmatpush3.msra.mxu0 %v1103_v28 }
 0x22a   : > { %1520 = vmatprep.subr.mxu1 %v1596_v1  ;;  %1512 = vmatprep.mubr.msk.f32.mxu1 %vm1597_vm0, %v1596_v1 }
 0x22b   : > { %1521 = vmatpush3.msra.mxu1 %v779_v15  ;;  %1552 = vmatprep.subr.mxu0 %v1596_v1 }
 0x22c   : > { %v655_v31 = vpop.permute.xlu1 %654  ;;  %1513 = vmatmul.mubr.msk.f32.gmra.mxu1 %vm806_vm6, %v1321_v30  ;;  %1522 = vmatprep.subr.mxu1 %v1596_v1  ;;  %v995_v32 = vpop.permute.xlu0 %994 }
 0x22d   : > { %v663_v33 = vadd.f32 %v655_v31, %v648_v19  ;;  %1523 = vmatpush3.msra.mxu1 %v774_v13  ;;  %1515 = vmatprep.mubr.msk.f32.mxu1 %vm1597_vm0, %v1596_v1 }
 0x22e   : > { %1533 = vmatprep.subr.mxu1 %v1596_v1 }
 0x22f   : > { %1582 = vrsqrt.f32 %v663_v33  ;;  %vm668_vm8 = vcmp.eq.f32.partialorder %v663_v33, inf  ;;  %v671_v49 = vand.u32 2147483648, %v663_v33  ;;  %vm670_vm9 = vcmp.eq.f32.partialorder %v663_v33, 0.0 }
 0x230   : > { %v659_v36 = vpop.permute.xlu1 %658  ;;  %1516 = vmatmul.mubr.msk.f32.gmra.mxu1 %vm806_vm6, %v1322_v34  ;;  %v1101_v37 = vpop.permute.xlu0 %1100 }
 0x231   : > { %v665_v38 = vadd.f32 %v659_v36, %v650_v20  ;;  %1553 = vmatpush3.msra.mxu0 %v1101_v37  ;;  %1524 = vmatprep.mubr.msk.f32.mxu1 %vm1597_vm0, %v1596_v1 }
 0x232   : > { %1555 = vmatmul.mubr.msk.f32.vlgmr.msra.gmra.mxu0 %vm806_vm6, %v1338_v35  ;;  %v1204_v35 = vld [vmem:[%s1928_s4 + $0x10] sm:$0xf] }
 0x233   : > { %1584 = vrsqrt.f32 %v665_v38  ;;  %1557 = vmatprep.mubr.msk.f32.mxu0 %vm1597_vm0, %v1596_v1  ;;  %vm682_vm11 = vcmp.eq.f32.partialorder %v665_v38, inf  ;;  %v685_v55 = vand.u32 2147483648, %v665_v38  ;;  %vm684_vm12 = vcmp.eq.f32.partialorder %v665_v38, 0.0 }
 0x234   : > { %1525 = vmatmul.mubr.msk.f32.vlgmr.msra.gmra.mxu1 %vm806_vm6, %v788_v39  ;;  %v657_v41 = vpop.permute.xlu0 %656 }
 0x235   : > { %1534 = vmatpush3.msk.msra.mxu1 %vm816_vm5, %v999_v23  ;;  %v664_v42 = vadd.f32 %v657_v41, %v649_v21  ;;  %1527 = vmatprep.mubr.msk.f32.mxu1 %vm1597_vm0, %v1596_v1 }
 0x236   : > { %1535 = vmatprep.subr.mxu1 %v1596_v1  ;;  %1558 = vmatmul.mubr.msk.f32.gmra.mxu0 %vm806_vm6, %v1339_v40 }
 0x237   : > { %1586 = vrsqrt.f32 %v664_v42  ;;  %1536 = vmatpush3.msra.mxu1 %v997_v29  ;;  %1560 = vmatprep.mubr.msk.f32.mxu0 %vm1597_vm0, %v1596_v1  ;;  %vm675_vm13 = vcmp.eq.f32.partialorder %v664_v42, inf  ;;  %v678_v61 = vand.u32 2147483648, %v664_v42  ;;  %vm677_vm14 = vcmp.eq.f32.partialorder %v664_v42, 0.0  ;;  %v1203_v29 = vld [vmem:[%s1928_s4 + $0x8] sm:$0xff] }
 0x238   : > { %1537 = vmatprep.subr.mxu1 %v1596_v1  ;;  %1528 = vmatmul.mubr.msk.f32.gmra.mxu1 %vm806_vm6, %v789_v43 }
 0x239   : > { %1538 = vmatpush3.msra.mxu1 %v995_v32  ;;  %1530 = vmatprep.mubr.msk.f32.mxu1 %vm1597_vm0, %v1596_v1 }
 0x23a   : > { %1561 = vmatmul.mubr.msk.f32.gmra.mxu0 %vm806_vm6, %v1340_v44 }
 0x23c   : > { %v1583_v46 = vpop.eup %1582  ;;  %1531 = vmatmul.mubr.msk.f32.gmra.mxu1 %vm806_vm6, %v790_v45 }
 0x23d   : > { %v667_v47 = vmul.f32 %v1583_v46, %v663_v33  ;;  %1539 = vmatprep.mubr.msk.f32.mxu1 %vm1597_vm0, %v1596_v1 }
 0x23f   : > { %v669_v50 = vsel %vm668_vm8, %v663_v33, %v667_v47 }
 0x240   : > { %v1585_v51 = vpop.eup %1584  ;;  %v672_v52 = vsel %vm670_vm9, %v671_v49, %v669_v50  ;;  %1540 = vmatmul.mubr.msk.f32.vlgmr.msra.gmra.mxu1 %vm806_vm6, %v1331_v48 }
 0x241   : > { %688 = vst.msk [vmem:[%s1886_s11] sm:$0xff] %vm687_vm7, %v672_v52  ;;  %v681_v53 = vmul.f32 %v1585_v51, %v665_v38  ;;  %1542 = vmatprep.mubr.msk.f32.mxu1 %vm1597_vm0, %v1596_v1 }
 0x243   : > { %v683_v56 = vsel %vm682_vm11, %v665_v38, %v681_v53 }
 0x244   : > { %v1587_v57 = vpop.eup %1586  ;;  %v686_v58 = vsel %vm684_vm12, %v685_v55, %v683_v56  ;;  %1543 = vmatmul.mubr.msk.f32.gmra.mxu1 %vm806_vm6, %v1332_v54 }
 0x245   : > { %691 = vst.msk [vmem:[%s1886_s11 + $0x10] sm:$0x1] %vm690_vm10, %v686_v58  ;;  %v674_v59 = vmul.f32 %v1587_v57, %v664_v42  ;;  %1545 = vmatprep.mubr.msk.f32.mxu1 %vm1597_vm0, %v1596_v1 }
 0x247   : > { %v676_v62 = vsel %vm675_vm13, %v664_v42, %v674_v59 }
 0x248   : > { %v679_v63 = vsel %vm677_vm14, %v678_v61, %v676_v62  ;;  %1546 = vmatmul.mubr.msk.f32.gmra.mxu1 %vm806_vm6, %v1333_v60 }
 0x249   : > { %689 = vst.msk [vmem:[%s1886_s11 + $0x8] sm:$0xff] %vm687_vm7, %v679_v63 }
 0x2e8   : > { %v885_v0 = vpop.f32.mrf.mxu1 }
 0x2ea   : > { %v1511_v2 = vpop.f32.mrf.mxu1 }
 0x2ec   : > { %v890_v3 = vpop.f32.mrf.mxu1 }
 0x2ee   : > { %v1514_v4 = vpop.f32.mrf.mxu1 }
 0x2f0   : > { %v895_v5 = vpop.f32.mrf.mxu1 }
 0x2f2   : > { %v1517_v6 = vpop.f32.mrf.mxu1  ;;  %v1185_v1 = vpop.f32.mrf.mxu0 }
 0x2f4   : > { %v976_v7 = vpop.f32.mrf.mxu1  ;;  %v1556_v8 = vpop.f32.mrf.mxu0 }
 0x2f5   : > { %v977_v18 = vadd.f32 %v976_v7, %v885_v0 }
 0x2f6   : > { %v1526_v9 = vpop.f32.mrf.mxu1  ;;  %v1190_v10 = vpop.f32.mrf.mxu0 }
 0x2f8   : > { %v981_v11 = vpop.f32.mrf.mxu1  ;;  %v1559_v12 = vpop.f32.mrf.mxu0 }
 0x2f9   : > { %v982_v23 = vadd.f32 %v981_v11, %v890_v3 }
 0x2fa   : > { %v1529_v13 = vpop.f32.mrf.mxu1  ;;  %v1195_v14 = vpop.f32.mrf.mxu0 }
 0x2fc   : > { %v986_v15 = vpop.f32.mrf.mxu1  ;;  %v1562_v16 = vpop.f32.mrf.mxu0 }
 0x2fd   : > { %v987_v30 = vadd.f32 %v986_v15, %v895_v5 }
 0x2fe   : > { %v1532_v17 = vpop.f32.mrf.mxu1 }
 0x300   : > { %v1079_v19 = vpop.f32.mrf.mxu1 }
 0x301   : > { %v1093_v20 = vadd.f32 %v1079_v19, %v977_v18 }
 0x302   : > { %v1541_v21 = vpop.f32.mrf.mxu1 }
 0x303   : > { %v1199_v24 = vadd.f32 %v1185_v1, %v1093_v20 }
 0x304   : > { %v1084_v25 = vpop.f32.mrf.mxu1 }
 0x305   : > { %v1205_v26 = vmul.f32 %v1202_v22, %v1199_v24  ;;  %v1094_v27 = vadd.f32 %v1084_v25, %v982_v23 }
 0x306   : > { %v1544_v28 = vpop.f32.mrf.mxu1 }
 0x307   : > { %1208 = vst.msk [vmem:[%s264_s20] sm:$0xff] %vm285_vm1, %v1205_v26  ;;  %v1200_v31 = vadd.f32 %v1190_v10, %v1094_v27 }
 0x308   : > { %v1089_v32 = vpop.f32.mrf.mxu1 }
 0x309   : > { %v1206_v33 = vmul.f32 %v1203_v29, %v1200_v31  ;;  %v1095_v34 = vadd.f32 %v1089_v32, %v987_v30 }
 0x30a   : > { %v1547_v36 = vpop.f32.mrf.mxu1 }
 0x30b   : > { %1209 = vst.msk [vmem:[%s264_s20 + $0x8] sm:$0xff] %vm285_vm1, %v1206_v33  ;;  %v1201_v37 = vadd.f32 %v1195_v14, %v1095_v34 }
 0x30d   : > { %v1207_v38 = vmul.f32 %v1204_v35, %v1201_v37 }
 0x30f   : > { %1211 = vst.msk [vmem:[%s264_s20 + $0x10] sm:$0xf] %vm1210_vm15, %v1207_v38 }
 0x310 PF: > { %s17_s21 = sadd.s32 1, %s1594_s21  }
 0x311   : > { %p14_p4 = scmp.ge.s32.totalorder %s17_s21, 4  }
 0x313   :  { %16 = sbr.rel (!%p14_p4) target bundleno = 1 (0x1), region = 85 }

</bundles_post_ra>
